<compile_context>
chip_gen: v6e
topology: v6e:2x2x1
jax: 0.10.0
libtpu: 0.0.40
codegen_flags: <defaults>
</compile_context>

<pallas_src>
import jax
import jax.numpy as jnp
from jax.experimental import pallas as pl
from jax.experimental.pallas import tpu as pltpu


# -----------------------------------------------------------------------------
# Band matrices (built ONCE in the wrapper; entries in {0, +1, -1}; the 1/2
# Haar scale is applied in-kernel right before the stores, so bf16 stays exact)
# -----------------------------------------------------------------------------
def _haar_quadrant_matrices(w, dtype):
    """G_low, G_high of shape (2W, W/2) acting on rows laid out as
    [even image row (W) | odd image row (W)].

      ll_raw[k] = a + b + c + d      hh_raw[k] = a - b - c + d
    with a = x[2r, 2k], c = x[2r, 2k+1], b = x[2r+1, 2k], d = x[2r+1, 2k+1].
    """
    w2 = w // 2
    j = jax.lax.broadcasted_iota(jnp.int32, (2 * w, w2), 0)   # flattened input idx
    k = jax.lax.broadcasted_iota(jnp.int32, (2 * w, w2), 1)   # output column
    col = jnp.where(j < w, j, j - w)      # column within the even/odd row half
    odd_row = j >= w
    even_col = col == 2 * k
    odd_col = col == 2 * k + 1
    hit = even_col | odd_col
    g_low = jnp.where(hit, 1.0, 0.0)
    sign = jnp.where(odd_row == odd_col, 1.0, -1.0)   # a:+1, c:-1, b:-1, d:+1
    g_high = jnp.where(hit, sign, 0.0)
    return g_low.astype(dtype), g_high.astype(dtype)
    # TODO(synk): for very large W (>~2048) these dense (2W, W/2) matrices get
    # big; a banded/segmented formulation would be needed there.


# -----------------------------------------------------------------------------
# Kernel: two MXU matmuls against the resident band matrices, scale, store.
# -----------------------------------------------------------------------------
def _dwt_llhh_kernel(x_ref, gl_ref, gh_ref, ll_ref, hh_ref):
    x = x_ref[...]                               # (m_tile, 2W)
    gl = gl_ref[...]                             # (2W, W/2), resident
    gh = gh_ref[...]
    if x.dtype != gl.dtype:                      # e.g. f16/int inputs -> f32
        x = x.astype(gl.dtype)
    ll = jnp.dot(x, gl, preferred_element_type=jnp.float32)
    hh = jnp.dot(x, gh, preferred_element_type=jnp.float32)
    ll_ref[...] = (ll * 0.5).astype(ll_ref.dtype)
    hh_ref[...] = (hh * 0.5).astype(hh_ref.dtype)


# -----------------------------------------------------------------------------
# Tiling helpers (generation-aware VMEM budget, dtype-aware sublane alignment)
# -----------------------------------------------------------------------------
def _vmem_capacity_bytes():
    try:
        info = pltpu.get_tpu_info()
        cap = getattr(info, "vmem_capacity_bytes", None)
        if cap:
            return int(cap)
    except Exception:
        pass
    return 64 << 20          # conservative fallback = v7x per-TensorCore VMEM


def _pick_m_tile(m_total, w, in_itemsize, g_itemsize, budget, sub_min,
                 target_steps=8):
    w2 = w // 2

    def footprint(m):
        x_blk = m * 2 * w * in_itemsize            # input block
        out_blk = 2 * m * w2 * in_itemsize         # ll + hh blocks
        mats = 2 * (2 * w) * w2 * g_itemsize       # resident G_low / G_high
        acc = 2 * m * w2 * 4                       # f32 matmul results pre-cast
        return 2 * (x_blk + out_blk + mats) + acc  # x2: Pallas double-buffers I/O

    if m_total <= sub_min:
        return m_total
    cands = [d for d in range(sub_min, m_total + 1, sub_min) if m_total % d == 0]
    if not cands:
        return m_total                             # unaligned M: use full dim
    cands.sort(reverse=True)
    m = next((d for d in cands if footprint(d) <= budget), cands[-1])
    # Several grid steps so input/output DMA pipelines and both v7x TCs get work.
    while (m_total // m) < target_steps and m % 2 == 0 and (m // 2) % sub_min == 0:
        m //= 2
    return m


# -----------------------------------------------------------------------------
# Wrapper: fused 2-D Haar DWT emitting only the LL and HH quadrants.
# -----------------------------------------------------------------------------
def dwt_ll_hh(x, *, m_tile=None):
    B, C, H, W = x.shape
    if H % 2 or W % 2:
        raise ValueError(f"Haar DWT requires even spatial dims, got H={H}, W={W}")
    H2, W2 = H // 2, W // 2
    M = B * C * H2
    out_dt = x.dtype

    gdt = jnp.bfloat16 if x.dtype == jnp.bfloat16 else jnp.float32
    g_low, g_high = _haar_quadrant_matrices(W, gdt)

    # Free contiguous view: each output row gets [even image row | odd image row].
    x2 = x.reshape(M, 2 * W)

    in_itemsize = x.dtype.itemsize
    g_itemsize = jnp.dtype(gdt).itemsize
    sub_min = 8 if in_itemsize >= 4 else 16        # f32: (8,128) tile, bf16: (16,128)

    cap = _vmem_capacity_bytes()
    budget = cap // 3                              # block budget, leaves headroom
    vmem_limit = int(cap * 3 // 4)

    if m_tile is None:
        m_tile = _pick_m_tile(M, W, in_itemsize, g_itemsize, budget, sub_min)
    if M % m_tile:
        raise ValueError(f"m_tile={m_tile} must divide B*C*H/2={M}")

    ll_flat, hh_flat = pl.pallas_call(
        _dwt_llhh_kernel,
        out_shape=(jax.ShapeDtypeStruct((M, W2), out_dt),
                   jax.ShapeDtypeStruct((M, W2), out_dt)),
        grid=(M // m_tile,),
        in_specs=[
            pl.BlockSpec((m_tile, 2 * W), lambda i: (i, 0)),
            pl.BlockSpec((2 * W, W2), lambda i: (0, 0)),   # resident (index const)
            pl.BlockSpec((2 * W, W2), lambda i: (0, 0)),   # resident (index const)
        ],
        out_specs=(
            pl.BlockSpec((m_tile, W2), lambda i: (i, 0)),
            pl.BlockSpec((m_tile, W2), lambda i: (i, 0)),
        ),
        compiler_params=pltpu.CompilerParams(
            dimension_semantics=("parallel",),
            vmem_limit_bytes=vmem_limit,
        ),
    )(x2, g_low, g_high)

    return ll_flat.reshape(B, C, H2, W2), hh_flat.reshape(B, C, H2, W2)


# -----------------------------------------------------------------------------
# feature_extractor forward
# -----------------------------------------------------------------------------
def feature_extractor_forward(x):
    # The PyTorch forward also computes conv1_l(ll), conv1_m(cat4), conv1_h(cat3)
    # and concatenates them, but that result is discarded (the module returns
    # only (hh, ll)); the dead 1x1-conv path is intentionally omitted.
    # TODO(synk): self.Upsample (IDWT_2D_ll) is constructed in __init__ but never
    # used in forward, so it is intentionally not implemented here.
    ll, hh = dwt_ll_hh(x)
    return hh, ll


# -----------------------------------------------------------------------------
if __name__ == "__main__":
    key = jax.random.PRNGKey(0)
    x = jax.random.normal(key, (2, 3, 16, 16), jnp.float32)    # NCHW, like PyTorch

    hh, ll = jax.jit(feature_extractor_forward)(x)
    jax.block_until_ready((hh, ll))

    # Pure-JAX Haar reference (strided-slice formulation)
    a = x[:, :, 0::2, 0::2]
    b = x[:, :, 1::2, 0::2]
    c = x[:, :, 0::2, 1::2]
    d = x[:, :, 1::2, 1::2]
    ll_ref = (a + b + c + d) * 0.5
    hh_ref = (a - b - c + d) * 0.5
    assert hh.shape == (2, 3, 8, 8) and ll.shape == (2, 3, 8, 8)
    assert jnp.allclose(ll, ll_ref, atol=1e-5), "ll mismatch"
    assert jnp.allclose(hh, hh_ref, atol=1e-5), "hh mismatch"

    # Exercise the bf16 path ({0,+-1} matrices + 0.5 post-scale keep it exact up
    # to input/output bf16 rounding).
    xb = x.astype(jnp.bfloat16)
    hh_b, ll_b = jax.jit(feature_extractor_forward)(xb)
    jax.block_until_ready((hh_b, ll_b))
    assert jnp.allclose(ll_b.astype(jnp.float32), ll_ref, atol=2e-2, rtol=2e-2), "bf16 ll mismatch"
    assert jnp.allclose(hh_b.astype(jnp.float32), hh_ref, atol=2e-2, rtol=2e-2), "bf16 hh mismatch"

    print("KERNEL_OK")
</pallas_src>

<mosaic_0001>
module attributes {stable_mosaic.version = 11 : i64} {
  func.func @_dwt_llhh_kernel(%arg0: i32, %arg1: memref<24x32xf32, #tpu.memory_space<vmem>>, %arg2: memref<32x8xf32, #tpu.memory_space<vmem>>, %arg3: memref<32x8xf32, #tpu.memory_space<vmem>>, %arg4: memref<24x8xf32, #tpu.memory_space<vmem>>, %arg5: memref<24x8xf32, #tpu.memory_space<vmem>>) attributes {dimension_semantics = [#tpu.dimension_semantics<parallel>], iteration_bounds = array<i64: 2>, scalar_prefetch = 0 : i64, scratch_operands = 0 : i64, tpu.core_type = #tpu.core_type<tc>, window_params = [{transform_indices = @transform_0, window_bounds = array<i64: 24, 32>}, {pipeline_mode = #tpu.pipeline_mode<synchronous>, transform_indices = @transform_1, window_bounds = array<i64: 32, 8>}, {pipeline_mode = #tpu.pipeline_mode<synchronous>, transform_indices = @transform_2, window_bounds = array<i64: 32, 8>}, {transform_indices = @transform_3, window_bounds = array<i64: 24, 8>}, {transform_indices = @transform_4, window_bounds = array<i64: 24, 8>}]} {
    %c0 = arith.constant 0 : index
    %c0_0 = arith.constant 0 : index
    %0 = vector.load %arg1[%c0, %c0_0] : memref<24x32xf32, #tpu.memory_space<vmem>>, vector<24x32xf32>
    %c0_1 = arith.constant 0 : index
    %c0_2 = arith.constant 0 : index
    %1 = vector.load %arg2[%c0_1, %c0_2] : memref<32x8xf32, #tpu.memory_space<vmem>>, vector<32x8xf32>
    %c0_3 = arith.constant 0 : index
    %c0_4 = arith.constant 0 : index
    %2 = vector.load %arg3[%c0_3, %c0_4] : memref<32x8xf32, #tpu.memory_space<vmem>>, vector<32x8xf32>
    %cst = arith.constant dense<0.000000e+00> : vector<24x8xf32>
    %3 = tpu.matmul %0, %1, %cst {dimension_numbers = #tpu.dot_dimension_numbers<[1], [0], [0], [1], [0, 0, 1, 1], [], []>} : vector<24x32xf32>, vector<32x8xf32>, vector<24x8xf32> -> vector<24x8xf32>
    %cst_5 = arith.constant dense<0.000000e+00> : vector<24x8xf32>
    %4 = tpu.matmul %0, %2, %cst_5 {dimension_numbers = #tpu.dot_dimension_numbers<[1], [0], [0], [1], [0, 0, 1, 1], [], []>} : vector<24x32xf32>, vector<32x8xf32>, vector<24x8xf32> -> vector<24x8xf32>
    %cst_6 = arith.constant 5.000000e-01 : f32
    %5 = vector.broadcast %cst_6 : f32 to vector<24x8xf32>
    %6 = arith.mulf %3, %5 : vector<24x8xf32>
    %c0_7 = arith.constant 0 : index
    %c0_8 = arith.constant 0 : index
    %7 = vector.load %arg4[%c0_7, %c0_8] : memref<24x8xf32, #tpu.memory_space<vmem>>, vector<24x8xf32>
    tpu.vector_store %arg4[%c0_7, %c0_8], %6 {strides = array<i32>} : memref<24x8xf32, #tpu.memory_space<vmem>>, vector<24x8xf32>,
    %cst_9 = arith.constant 5.000000e-01 : f32
    %8 = vector.broadcast %cst_9 : f32 to vector<24x8xf32>
    %9 = arith.mulf %4, %8 : vector<24x8xf32>
    %c0_10 = arith.constant 0 : index
    %c0_11 = arith.constant 0 : index
    %10 = vector.load %arg5[%c0_10, %c0_11] : memref<24x8xf32, #tpu.memory_space<vmem>>, vector<24x8xf32>
    tpu.vector_store %arg5[%c0_10, %c0_11], %9 {strides = array<i32>} : memref<24x8xf32, #tpu.memory_space<vmem>>, vector<24x8xf32>,
    return
  }
  func.func @transform_0(%arg0: i32) -> (i32, i32) {
    %c0_i32 = arith.constant 0 : i32
    %c0_i32_0 = arith.constant 0 : i32
    return %arg0, %c0_i32 : i32, i32
  }
  func.func @transform_1(%arg0: i32) -> (i32, i32) {
    %c0_i32 = arith.constant 0 : i32
    %c0_i32_0 = arith.constant 0 : i32
    %c0_i32_1 = arith.constant 0 : i32
    return %c0_i32, %c0_i32_0 : i32, i32
  }
  func.func @transform_2(%arg0: i32) -> (i32, i32) {
    %c0_i32 = arith.constant 0 : i32
    %c0_i32_0 = arith.constant 0 : i32
    %c0_i32_1 = arith.constant 0 : i32
    return %c0_i32, %c0_i32_0 : i32, i32
  }
  func.func @transform_3(%arg0: i32) -> (i32, i32) {
    %c0_i32 = arith.constant 0 : i32
    %c0_i32_0 = arith.constant 0 : i32
    return %arg0, %c0_i32 : i32, i32
  }
  func.func @transform_4(%arg0: i32) -> (i32, i32) {
    %c0_i32 = arith.constant 0 : i32
    %c0_i32_0 = arith.constant 0 : i32
    return %arg0, %c0_i32 : i32, i32
  }
}

</mosaic_0001>

<bundles_post_ra>
// kernel: feature_extractor_forward.1
= control target key start
LH: loop header
LB: loop body
LE: loop exit
PB: predicated region body
PF: predicated region fallthrough
CT: control target
= control target key end

     0   :  { %10 = vsyncpa [#allocation3], 0  ;;  %s945_s0 = inlined_call_operand.vmem [shape: f32[48,32], index: 0, kind: input, shape index: {}]   ;;  %s946_s1 = inlined_call_operand.vmem [shape: f32[32,8], index: 1, kind: input, shape index: {}]   ;;  %s947_s2 = inlined_call_operand.vmem [shape: f32[32,8], index: 2, kind: input, shape index: {}]   ;;  %s948_s3 = inlined_call_operand.hbm [shape: f32[48,8], index: 3, kind: output, shape index: {0}]   ;;  %s949_s4 = inlined_call_operand.hbm [shape: f32[48,8], index: 4, kind: output, shape index: {1}]  }
   0x1   :  { %12 = vsyncpa [#allocation3 + $0x1], 0 }
   0x2   :  { %13 = vsyncpa [#allocation5], 0 }
   0x3   :  { %15 = vsyncpa [#allocation5 + $0x1], 0  ;;  %s771_s15 = smov 0   ;;  %s773_s16 = smov 0  }
   0x4   :  { %s775_s17 = smov 0   ;;  %s777_s18 = smov 0  }
   0x5 LB: > { %s792_s19 = sadd.s32 4294967295, %s738_s18   ;;  %s534_s20 = sadd.s32 4294967294, %s738_s18   ;;  %s738_s18 = sphi %s777_s18, %s955_s18   ;;  %s734_s17 = sphi %s775_s17, %s954_s17   ;;  %s730_s16 = sphi %s773_s16, %s953_s16   ;;  %s726_s15 = sphi %s771_s15, %s952_s15  }
   0x6   : > { %s796_s21 = sadd.s32 1, %s738_s18   ;;  %s96_s22 = sadd.s32 1, %s734_s17 }
   0x7   : > { %s93_s23 = ssub.s32 %s738_s18, %s796_s21  ;;  %p106_p0 = scmp.ne.s32.totalorder %s734_s17, %s730_s16 }
   0x8   : > { %p94_p1 = scmp.eq.s32.totalorder %s93_s23, 0  ;;  %p107_p2 = scmp.eq.s32.totalorder %s792_s19, 1 }
   0x9   : > { %p112_p3 = scmp.ne.s32.totalorder %s730_s16, %s726_s15  ;;  %p113_p4 = scmp.eq.s32.totalorder %s534_s20, 1 }
   0xa   : > { %s807_s24 = scalar_select %p94_p1, %s734_s17, %s96_s22  }
   0xb   : > { %p809_p5 = por %p107_p2, %p106_p0  ;;  %p813_p6 = por %p113_p4, %p112_p3 }
   0xc   : > { %p537_p7 = scmp.ge.s32.totalorder %s738_s18, 1  ;;  %p172_p8 = scmp.lt.s32.totalorder %s738_s18, 3 }
   0xe   : > { %p173_p9 = pnand %p537_p7, %p172_p8 }
   0xf   : > { %s203_s5 = smul.u32 (!%p173_p9), 3, %s792_s19  ;;  %s742_s28 = smov (!%p173_p9), [#allocation2]  }
  0x10   : > { %176 = sbr.rel (%p173_p9) target bundleno = 270 (0x10e), region = 32  ;;  %s652_s29 = sshll.u32 (!%p173_p9), %s742_s28, 4  ;;  %s653_s29 = int_to_ptr.vmem [resolvable:$false] %s652_s29 }
  0x11   : > { %p204_p10 = scmp.lt.s32.totalorder (!%p173_p9), %s203_s5, 5  ;;  %s549_s11 = smul.u32 (!%p173_p9), 384, %s792_s19 }
  0x13   : > { %s869_s13 = scalar_lea.hbm (!%p173_p9), %s948_s3, %s549_s11  ;;  %s874_s22 = scalar_lea.hbm (!%p173_p9), %s949_s4, %s549_s11 }
  0x15   : > { %v217_v0 = vld [vmem:[%s946_s1 + $0x18] sm:$0xff]  ;;  %v740_v2 = vmov 0.0   ;;  %v216_v3 = vld [vmem:[%s946_s1 + $0x10] sm:$0xff]  ;;  %v215_v5 = vld [vmem:[%s946_s1 + $0x8] sm:$0xff]  ;;  %s957_s5 = smov (!%p204_p10, %s203_s5), 5  ;;  %vm222_vm0 = vcmask 261120  }
  0x16   : > { %v221_v1 = vld [vmem:[%s947_s2 + $0x18] sm:$0xff]  ;;  %565 = vmatprep.subr.mxu0 %v740_v2  ;;  %582 = vmatprep.subr.mxu1 %v740_v2  ;;  %v220_v4 = vld [vmem:[%s947_s2 + $0x10] sm:$0xff]  ;;  %v219_v6 = vld [vmem:[%s947_s2 + $0x8] sm:$0xff]  ;;  %s538_s27 = sshll.u32 %s957_s5, 3  ;;  %vm741_vm1 = vmmov 0   ;;  %s854_s5 = sand.u32 1, %s730_s16  }
  0x17   : > { %566 = vmatpush3.msra.mxu0 %v217_v0  ;;  %583 = vmatpush3.msra.mxu1 %v221_v1  ;;  %v214_v7 = vld [vmem:[%s946_s1] sm:$0xff]  ;;  %s207_s30 = scalar_lea.vmem %s945_s0, %s538_s27  ;;  %s599_s6 = smul.u32 24, %s854_s5  ;;  %vm395_vm2 = vcmask 64512  }
  0x18   : > { %567 = vmatprep.subr.mxu0 %v740_v2  ;;  %584 = vmatprep.subr.mxu1 %v740_v2  ;;  %v218_v8 = vld [vmem:[%s947_s2] sm:$0xff]  ;;  %v212_v10 = vld [vmem:[%s207_s30 + $0x8] sm:$0xff]  ;;  %v213_v11 = vld [vmem:[%s207_s30 + $0x10] sm:$0xff]  ;;  %s406_s23 = scalar_lea.sflag [#allocation3], %s854_s5 }
  0x19   : > { %568 = vmatpush3.msra.mxu0 %v216_v3  ;;  %585 = vmatpush3.msra.mxu1 %v220_v4  ;;  %v211_v9 = vld [vmem:[%s207_s30] sm:$0xff]  ;;  %s195_s7 = scalar_lea.vmem [#allocation2], %s599_s6  ;;  %s202_s9 = scalar_lea.vmem [#allocation4], %s599_s6 }
  0x1a   : > { %569 = vmatprep.subr.mxu0 %v740_v2  ;;  %586 = vmatprep.subr.mxu1 %v740_v2  ;;  %s424_s8 = sshll.u32 %s195_s7, 4  ;;  %s440_s10 = sshll.u32 %s202_s9, 4  ;;  %s860_s8 = int_to_ptr.vmem [resolvable:$true] %s424_s8  ;;  %s862_s10 = int_to_ptr.vmem [resolvable:$true] %s440_s10 }
  0x1b   : > { %570 = vmatpush3.msra.mxu0 %v215_v5  ;;  %587 = vmatpush3.msra.mxu1 %v219_v6  ;;  %s648_s27 = scalar_lea.vmem %s860_s8, 384  ;;  %s654_s30 = scalar_lea.vmem %s653_s29, 768 }
  0x1c   : > { %571 = vmatprep.subr.mxu0 %v740_v2  ;;  %588 = vmatprep.subr.mxu1 %v740_v2  ;;  %p649_p11 = scmp.ne.s32.totalorder %s860_s8, %s648_s27  ;;  %p655_p0 = scmp.lt.s32.totalorder %s860_s8, %s653_s29 }
  0x1d   : > { %572 = vmatpush3.msra.mxu0 %v214_v7  ;;  %573 = vmatprep.mubr.msk.f32.mxu0 %vm741_vm1, %v740_v2  ;;  %p656_p1 = scmp.lt.s32.totalorder %s654_s30, %s648_s27 }
  0x1e   : > { %589 = vmatpush3.msra.mxu1 %v218_v8  ;;  %590 = vmatprep.mubr.msk.f32.mxu1 %vm741_vm1, %v740_v2  ;;  %p650_p12 = pnand %p649_p11, %p809_p5 }
  0x1f   : > { %574 = vmatmul.mubr.msk.f32.vlgmr.msra.gmra.mxu0 %vm222_vm0, %v211_v9  ;;  %591 = vmatmul.mubr.msk.f32.vlgmr.msra.gmra.mxu1 %vm222_vm0, %v211_v9  ;;  %p657_p2 = por %p656_p1, %p655_p0 }
  0x20   : > { %576 = vmatprep.mubr.msk.f32.mxu0 %vm741_vm1, %v740_v2  ;;  %593 = vmatprep.mubr.msk.f32.mxu1 %vm741_vm1, %v740_v2  ;;  %p651_p13 = pneg %p650_p12 }
  0x22   : > { %p658_p3 = pnand %p657_p2, %p651_p13 }
  0x23   : > { %577 = vmatmul.mubr.msk.f32.gmra.mxu0 %vm222_vm0, %v212_v10  ;;  %594 = vmatmul.mubr.msk.f32.gmra.mxu1 %vm222_vm0, %v212_v10 }
  0x24   : > { %579 = vmatprep.mubr.msk.f32.mxu0 %vm741_vm1, %v740_v2  ;;  %596 = vmatprep.mubr.msk.f32.mxu1 %vm741_vm1, %v740_v2 }
  0x27   : > { %580 = vmatmul.mubr.msk.f32.gmra.mxu0 %vm222_vm0, %v213_v11  ;;  %597 = vmatmul.mubr.msk.f32.gmra.mxu1 %vm222_vm0, %v213_v11 }
  0xdf   : > { %v298_v12 = vpop.f32.mrf.mxu0  ;;  %v378_v13 = vpop.f32.mrf.mxu1 }
  0xe0   : > { %v392_v14 = vmul.f32 0.5, %v298_v12  ;;  %v399_v15 = vmul.f32 0.5, %v378_v13 }
  0xe1   : > { %v575_v16 = vpop.f32.mrf.mxu0  ;;  %v592_v17 = vpop.f32.mrf.mxu1 }
  0xe2   : > { %396 = vst.msk [vmem:[%s195_s7] sm:$0xff] %vm395_vm2, %v392_v14  ;;  %402 = vst.msk [vmem:[%s202_s9] sm:$0xff] %vm395_vm2, %v399_v15 }
  0xe3   : > { %v303_v18 = vpop.f32.mrf.mxu0  ;;  %v383_v19 = vpop.f32.mrf.mxu1 }
  0xe4   : > { %v393_v20 = vmul.f32 0.5, %v303_v18  ;;  %v400_v21 = vmul.f32 0.5, %v383_v19 }
  0xe5   : > { %v578_v22 = vpop.f32.mrf.mxu0  ;;  %v595_v23 = vpop.f32.mrf.mxu1 }
  0xe6   : > { %397 = vst.msk [vmem:[%s195_s7 + $0x8] sm:$0xff] %vm395_vm2, %v393_v20  ;;  %403 = vst.msk [vmem:[%s202_s9 + $0x8] sm:$0xff] %vm395_vm2, %v400_v21 }
  0xe7   : > { %v308_v24 = vpop.f32.mrf.mxu0  ;;  %v388_v25 = vpop.f32.mrf.mxu1 }
  0xe8   : > { %v394_v26 = vmul.f32 0.5, %v308_v24  ;;  %v401_v27 = vmul.f32 0.5, %v388_v25 }
  0xe9   : > { %v581_v28 = vpop.f32.mrf.mxu0  ;;  %v598_v29 = vpop.f32.mrf.mxu1 }
  0xea   : > { %398 = vst.msk [vmem:[%s195_s7 + $0x10] sm:$0xff] %vm395_vm2, %v394_v26  ;;  %404 = vst.msk [vmem:[%s202_s9 + $0x10] sm:$0xff] %vm395_vm2, %v401_v27 }
  0xeb   : > { %661 = shalt.err (!%p658_p3)
}
  0xec   : > { %s662_s6 = scalar_lea.hbm %s869_s13, 384  ;;  %s666_s11 = scalar_lea.hbm %s948_s3, 768 }
  0xed   : > { %p663_p4 = scmp.ne.s32.totalorder %s869_s13, %s662_s6  ;;  %p667_p9 = scmp.lt.s32.totalorder %s869_s13, %s948_s3 }
  0xee   : > { %p668_p10 = scmp.lt.s32.totalorder %s666_s11, %s662_s6 }
  0xef   : > { %p664_p7 = pnand %p663_p4, %p809_p5 }
  0xf0   : > { %p669_p11 = por %p668_p10, %p667_p9 }
  0xf1   : > { %p665_p8 = pneg %p664_p7 }
  0xf3   : > { %p670_p12 = pnand %p669_p11, %p665_p8 }
  0xf5   : > { %673 = shalt.err (!%p670_p12)
}
  0xf6   : > { %s743_s14 = smov 128   ;;  %s744_s20 = smov 8  }
  0xf7   : > { %600 = dma.vmem_to_hbm [thread:$0]  (%p809_p5), %s860_s8, 384, %s869_s13, %s406_s23, %s743_s14, %s743_s14, %s744_s20  }
  0xf8   : > { %s411_s27 = scalar_lea.sflag [#allocation5], %s854_s5  ;;  %s674_s28 = scalar_lea.vmem %s862_s10, 384 }
  0xf9   : > { %p675_p13 = scmp.ne.s32.totalorder %s862_s10, %s674_s28  ;;  %s745_s29 = smov [#allocation4]  }
  0xfa   : > { %s678_s30 = sshll.u32 %s745_s29, 4  ;;  %s679_s30 = int_to_ptr.vmem [resolvable:$false] %s678_s30 }
  0xfb   : > { %p676_p0 = pnand %p675_p13, %p809_p5  ;;  %s680_s6 = scalar_lea.vmem %s679_s30, 768 }
  0xfc   : > { %p681_p2 = scmp.lt.s32.totalorder %s862_s10, %s679_s30  ;;  %p682_p3 = scmp.lt.s32.totalorder %s680_s6, %s674_s28 }
  0xfd   : > { %p677_p1 = pneg %p676_p0 }
  0xfe   : > { %p683_p4 = por %p682_p3, %p681_p2 }
 0x100   : > { %p684_p7 = pnand %p683_p4, %p677_p1 }
 0x102   : > { %687 = shalt.err (!%p684_p7)
}
 0x103   : > { %s688_s8 = scalar_lea.hbm %s874_s22, 384  ;;  %s692_s23 = scalar_lea.hbm %s949_s4, 768 }
 0x104   : > { %p689_p8 = scmp.ne.s32.totalorder %s874_s22, %s688_s8  ;;  %p693_p11 = scmp.lt.s32.totalorder %s874_s22, %s949_s4 }
 0x105   : > { %p694_p12 = scmp.lt.s32.totalorder %s692_s23, %s688_s8 }
 0x106   : > { %p690_p9 = pnand %p689_p8, %p809_p5 }
 0x107   : > { %p695_p13 = por %p694_p12, %p693_p11 }
 0x108   : > { %p691_p10 = pneg %p690_p9 }
 0x10a   : > { %p696_p0 = pnand %p695_p13, %p691_p10 }
 0x10c   : > { %699 = shalt.err (!%p696_p0)
}
 0x10d   : > { %601 = dma.vmem_to_hbm [thread:$0]  (%p809_p5), %s862_s10, 384, %s874_s22, %s411_s27, %s743_s14, %s743_s14, %s744_s20  }
 0x10e PF: > { %p611_p1 = scmp.ge.s32.totalorder %s738_s18, 2  ;;  %s455_s11 = sand.u32 1, %s726_s15  }
 0x10f   : > { %s456_s12 = scalar_lea.sflag [#allocation3], %s455_s11 }
 0x110   : > { %p605_p2 = pnand %p611_p1, %p813_p6 }
 0x112   : > { %p606_p3 = pneg %p605_p2 }
 0x114   : > { %717 = dma.done.wait (%p606_p3), %s456_s12, 384  }
 0x115   : > { %719 = vsyncadd (%p606_p3), %s456_s12, 4294966912  ;;  %s465_s19 = scalar_lea.sflag [#allocation5], %s455_s11 }
 0x116   : > { %721 = dma.done.wait (%p606_p3), %s465_s19, 384  }
 0x117   : > { %723 = vsyncadd (%p606_p3), %s465_s19, 4294966912  ;;  %p18_p5 = scmp.ge.s32.totalorder %s796_s21, 4   ;;  %s952_s15 = smov %s730_s16 }
 0x118   : > { %s953_s16 = smov %s734_s17  ;;  %s954_s17 = smov %s807_s24 }
 0x119   : > { %s955_s18 = smov %s796_s21  ;;  %20 = sbr.rel (!%p18_p5) target bundleno = 5 (0x5), region = 84 }
 0x11e   :  { %470 = vsyncpa [#allocation3], 1 }
 0x11f   :  { %472 = vsyncpa [#allocation3 + $0x1], 1 }
 0x120   :  { %473 = vsyncpa [#allocation5], 1 }
 0x121   :  { %475 = vsyncpa [#allocation5 + $0x1], 1 }

</bundles_post_ra>
